<compile_context>
chip_gen: v6e
topology: v6e:2x2x1
jax: 0.10.0
libtpu: 0.0.40
codegen_flags: <defaults>
</compile_context>

<pallas_src>
import functools

import jax
import jax.numpy as jnp
from jax.experimental import pallas as pl
from jax.experimental.pallas import tpu as pltpu


def _recall_ce_kernel(logits_ref, tgt_ref, out_ref, *, n_classes, h_total,
                      tile_rows, width, tiles_per_chunk, split, mask_rows):
    # logits_ref: (C, TH, W) f32/bf16 ; tgt_ref: (TH, W) int8/uint8/int32
    # out_ref:    (1, 3*C, 8, W) f32 resident accumulator
    #             rows [0:C] = gt, [C:2C] = fn, [2C:3C] = ce partial sums.
    C, TH, W = n_classes, tile_rows, width
    p = pl.program_id(0)
    j = pl.program_id(1)

    @pl.when(j == 0)
    def _init():
        out_ref[...] = jnp.zeros_like(out_ref)

    logits = logits_ref[...].astype(jnp.float32)      # (C, TH, W)
    tgt = tgt_ref[...].astype(jnp.int32)              # (TH, W)

    if C == 2:
        # softplus(l_other - l_target) == logsumexp(l0, l1) - l_target.
        l0, l1 = logits[0], logits[1]
        is1 = tgt == 1
        x = jnp.where(is1, l0 - l1, l1 - l0)
        ce = jnp.maximum(x, 0.0) + jnp.log(1.0 + jnp.exp(-jnp.abs(x)))
        wrong = (l1 > l0) != is1                      # argmax ties -> class 0
        class_masks = [tgt == 0, is1]
    else:
        # Generic path: stable log-sum-exp + first-max argmax over the small
        # static class axis.
        m = logits[0]
        for c in range(1, C):
            m = jnp.maximum(m, logits[c])
        s = jnp.zeros_like(m)
        best = logits[0]
        pred = jnp.zeros((TH, W), jnp.int32)
        tgt_logit = jnp.zeros_like(m)
        class_masks = []
        for c in range(C):
            lc = logits[c]
            s = s + jnp.exp(lc - m)
            mc = tgt == c
            class_masks.append(mc)
            tgt_logit = tgt_logit + jnp.where(mc, lc, 0.0)
            if c > 0:
                upd = lc > best                       # strict '>' => first max wins
                best = jnp.where(upd, lc, best)
                pred = jnp.where(upd, c, pred)
        ce = (m + jnp.log(s)) - tgt_logit
        wrong = pred != tgt

    if mask_rows:
        # Last H-tile of the image may run past H; mask the padded rows.
        ht = (p % split) * tiles_per_chunk + j if split > 1 else j
        row = jax.lax.broadcasted_iota(jnp.int32, (TH, W), 0)
        valid = (ht * TH + row) < h_total

    n8, rem = TH // 8, TH % 8

    def collapse(x):
        """(TH, W) f32 -> (8, W) partial sums via plain VALU adds."""
        head = None
        if n8 >= 1:
            head = x[0:8]
            for r in range(8, n8 * 8, 8):             # static 8-row slices
                head = head + x[r:r + 8]
        if rem:                                       # only when TH == H and H % 8 != 0
            tail = jnp.concatenate(
                [x[n8 * 8:], jnp.zeros((8 - rem, W), x.dtype)], axis=0)
            head = tail if head is None else head + tail
        return head

    for c in range(C):
        mc = class_masks[c]
        if mask_rows:
            mc = mc & valid
        out_ref[0, c] += collapse(mc.astype(jnp.float32))                    # gt
        out_ref[0, C + c] += collapse(jnp.where(mc & wrong, 1.0, 0.0))       # fn
        out_ref[0, 2 * C + c] += collapse(jnp.where(mc, ce, 0.0))            # ce


def _sublane_align(itemsize):
    """Second-minor block alignment for a dtype: f32/i32 -> 8, 16-bit -> 16, 8-bit -> 32."""
    return max(8 * (4 // max(int(itemsize), 1)), 8)


def _vmem_budget_and_cap():
    cap = 128 * 1024 * 1024
    try:
        cap = int(getattr(pltpu.get_tpu_info(), "vmem_capacity_bytes", cap))
    except Exception:
        pass
    # v5e/v6e (128 MiB): 48 MiB input working set; v7x (64 MiB): 32 MiB.
    budget = min(cap // 2, 48 * 1024 * 1024)
    return budget, cap


def _choose_tile_rows(H, W, C, logits_itemsize, tgt_itemsize, row_align, budget):
    """Largest aligned H-tile whose double-buffered inputs fit the VMEM budget."""
    bytes_per_row = (2 * C * logits_itemsize + 2 * tgt_itemsize) * W
    max_rows = max(int(budget // bytes_per_row), 1)
    if max_rows >= H or H <= row_align:
        return H                                      # whole image height per step
    th = max((max_rows // row_align) * row_align, row_align)
    th = min(th, (H // row_align) * row_align)
    # Prefer a tile height that divides H exactly (avoids remainder masking).
    for cand in range(th, row_align - 1, -row_align):
        if H % cand == 0:
            return cand
    return th


@functools.partial(jax.jit,
                   static_argnames=("n_classes", "tile_rows", "vmem_budget_bytes"))
def recall_cross_entropy(logits_nchw, target, n_classes=2, tile_rows=None,
                         vmem_budget_bytes=None):
    """Pallas implementation of RecallCrossEntropy.forward (no ignore pixels)."""
    N, C, H, W = logits_nchw.shape
    assert C == n_classes
    P = N * H * W

    # torch: target.squeeze(1).  Keep the native (narrow) integer dtype so the
    # kernel streams fewer HBM bytes; cast to int32 in VMEM.
    tgt = target[:, 0] if target.ndim == 4 else target
    if (not jnp.issubdtype(tgt.dtype, jnp.integer)
            or jnp.dtype(tgt.dtype).itemsize > 4):
        tgt = tgt.astype(jnp.int32)
    if logits_nchw.dtype not in (jnp.float32, jnp.bfloat16, jnp.float16):
        logits_nchw = logits_nchw.astype(jnp.float32)

    l_item = jnp.dtype(logits_nchw.dtype).itemsize
    t_item = jnp.dtype(tgt.dtype).itemsize
    row_align = max(_sublane_align(l_item), _sublane_align(t_item))

    budget, cap = _vmem_budget_and_cap()
    if vmem_budget_bytes is not None:
        budget = int(vmem_budget_bytes)
    vmem_limit = min(budget + (16 << 20), int(cap * 0.9))

    TH = int(tile_rows) if tile_rows is not None else _choose_tile_rows(
        H, W, C, l_item, t_item, row_align, budget)
    num_h_tiles = pl.cdiv(H, TH)
    mask_rows = (H % TH) != 0

    # v7x megacore: guarantee >= 2 iterations on the "parallel" axis when the
    # batch alone cannot keep both TensorCores busy.
    split = 2 if (N % 2 == 1 and num_h_tiles % 2 == 0) else 1
    tiles_per_chunk = num_h_tiles // split

    kernel = functools.partial(
        _recall_ce_kernel, n_classes=C, h_total=H, tile_rows=TH, width=W,
        tiles_per_chunk=tiles_per_chunk, split=split, mask_rows=mask_rows)

    def logits_map(p, j):
        if split > 1:
            return (p // split, 0, (p % split) * tiles_per_chunk + j, 0)
        return (p, 0, j, 0)

    def tgt_map(p, j):
        if split > 1:
            return (p // split, (p % split) * tiles_per_chunk + j, 0)
        return (p, j, 0)

    parts = pl.pallas_call(
        kernel,
        out_shape=jax.ShapeDtypeStruct((N * split, 3 * C, 8, W), jnp.float32),
        grid_spec=pltpu.PrefetchScalarGridSpec(
            num_scalar_prefetch=0,
            grid=(N * split, tiles_per_chunk),
            in_specs=[
                # NCHW logits tiled in place: one image, all classes, TH rows.
                pl.BlockSpec((pl.Squeezed(), C, TH, W), logits_map),
                pl.BlockSpec((pl.Squeezed(), TH, W), tgt_map),
            ],
            # Small resident accumulator block (constant over the H-tile axis).
            out_specs=pl.BlockSpec((1, 3 * C, 8, W), lambda p, j: (p, 0, 0, 0)),
        ),
        compiler_params=pltpu.CompilerParams(
            # Chunks are independent (megacore-parallel); H tiles reduce into
            # the per-chunk resident output block.
            dimension_semantics=("parallel", "arbitrary"),
            vmem_limit_bytes=vmem_limit),
    )(logits_nchw, tgt)

    # Tiny final reduction + torch.unique-style counters in plain JAX.
    sums = jnp.sum(parts, axis=(0, 2, 3))                 # (3*C,)
    gt_count, fn_count, ce_sum = sums[:C], sums[C:2 * C], sums[2 * C:]
    # torch.unique only touches classes that appear; missing classes keep 1.
    gt_counter = jnp.where(gt_count > 0, gt_count, 1.0)
    fn_counter = jnp.where(fn_count > 0, fn_count, 1.0)
    weight = fn_counter / gt_counter
    # loss.mean() == sum_c weight[c] * (sum of CE over pixels of class c) / P
    return jnp.sum(weight * ce_sum) / P


def _reference(logits_nchw, target, n_classes=2):
    """Pure-JAX reference mirroring the PyTorch forward (no ignore pixels)."""
    tgt = target[:, 0] if target.ndim == 4 else target
    tgt = tgt.astype(jnp.int32)
    logits_f32 = logits_nchw.astype(jnp.float32)
    pred = jnp.argmax(logits_f32, axis=1)
    wrong = pred != tgt
    gt_count = jnp.stack(
        [jnp.sum(tgt == c).astype(jnp.float32) for c in range(n_classes)])
    fn_count = jnp.stack(
        [jnp.sum((tgt == c) & wrong).astype(jnp.float32) for c in range(n_classes)])
    gt_counter = jnp.where(gt_count > 0, gt_count, 1.0)
    fn_counter = jnp.where(fn_count > 0, fn_count, 1.0)
    weight = fn_counter / gt_counter

    logits_nhwc = jnp.moveaxis(logits_f32, 1, -1)
    lse = jax.scipy.special.logsumexp(logits_nhwc, axis=-1)
    tgt_logit = jnp.take_along_axis(logits_nhwc, tgt[..., None], axis=-1)[..., 0]
    ce = lse - tgt_logit
    return jnp.mean(weight[tgt] * ce)


if __name__ == "__main__":
    key = jax.random.PRNGKey(0)
    k_logits, k_target = jax.random.split(key)

    # 1) Small shape consistent with the module (n_classes = 2 segmentation).
    N, C, H, W = 2, 2, 16, 16
    logits = jax.random.normal(k_logits, (N, C, H, W), dtype=jnp.float32)
    target = jax.random.randint(k_target, (N, 1, H, W), 0, C, dtype=jnp.int32)
    loss = jax.block_until_ready(recall_cross_entropy(logits, target, n_classes=C))
    ref = jax.block_until_ready(_reference(logits, target, n_classes=C))
    assert jnp.allclose(loss, ref, rtol=1e-5, atol=1e-6), (loss, ref)

    # 2) Several H tiles per image -> exercises the resident-output accumulator
    #    init/accumulate across the "arbitrary" grid axis.
    N2, C2, H2, W2 = 2, 2, 64, 128
    l2 = jax.random.normal(k_logits, (N2, C2, H2, W2), dtype=jnp.float32)
    t2 = jax.random.randint(k_target, (N2, 1, H2, W2), 0, C2, dtype=jnp.int32)
    loss2 = jax.block_until_ready(
        recall_cross_entropy(l2, t2, n_classes=C2, tile_rows=16))
    ref2 = jax.block_until_ready(_reference(l2, t2, n_classes=C2))
    assert jnp.allclose(loss2, ref2, rtol=1e-5, atol=1e-6), (loss2, ref2)

    # 3) Batch of 1 with bf16 logits + uint8 target -> exercises the
    #    narrow-dtype streaming paths and the H-split that keeps both v7x
    #    TensorCores busy when the batch axis alone cannot.
    N3, C3, H3, W3 = 1, 2, 64, 128
    l3 = jax.random.normal(k_logits, (N3, C3, H3, W3),
                           dtype=jnp.float32).astype(jnp.bfloat16)
    t3 = jax.random.randint(k_target, (N3, 1, H3, W3), 0, C3,
                            dtype=jnp.int32).astype(jnp.uint8)
    loss3 = jax.block_until_ready(
        recall_cross_entropy(l3, t3, n_classes=C3, tile_rows=32))
    ref3 = jax.block_until_ready(_reference(l3, t3, n_classes=C3))
    assert jnp.allclose(loss3, ref3, rtol=1e-4, atol=1e-5), (loss3, ref3)

    print("KERNEL_OK")
</pallas_src>

<mosaic_0001>
module attributes {stable_mosaic.version = 11 : i64} {
  func.func @_recall_ce_kernel(%arg0: i32, %arg1: i32, %arg2: memref<1x2x16x16xf32, #tpu.memory_space<vmem>>, %arg3: memref<1x16x16xi32, #tpu.memory_space<vmem>>, %arg4: memref<1x6x8x16xf32, #tpu.memory_space<vmem>>) attributes {dimension_semantics = [#tpu.dimension_semantics<parallel>, #tpu.dimension_semantics<arbitrary>], iteration_bounds = array<i64: 2, 1>, scalar_prefetch = 0 : i64, scratch_operands = 0 : i64, tpu.core_type = #tpu.core_type<tc>, window_params = [{transform_indices = @transform_0, window_bounds = array<i64: 1, 2, 16, 16>}, {transform_indices = @transform_1, window_bounds = array<i64: 1, 16, 16>}, {transform_indices = @transform_2, window_bounds = array<i64: 1, 6, 8, 16>}]} {
    %c0_i32 = arith.constant 0 : i32
    %0 = arith.cmpi eq, %arg1, %c0_i32 : i32
    %1 = arith.extui %0 : i1 to i32
    %c0_i32_0 = arith.constant 0 : i32
    %2 = arith.cmpi ne, %1, %c0_i32_0 : i32
    scf.if %2 {
      %cst_59 = arith.constant 0.000000e+00 : f32
      %100 = vector.broadcast %cst_59 : f32 to vector<1x6x8x16xf32>
      %c0_60 = arith.constant 0 : index
      %c0_61 = arith.constant 0 : index
      %c0_62 = arith.constant 0 : index
      %c0_63 = arith.constant 0 : index
      %101 = vector.load %arg4[%c0_60, %c0_61, %c0_62, %c0_63] : memref<1x6x8x16xf32, #tpu.memory_space<vmem>>, vector<1x6x8x16xf32>
      tpu.vector_store %arg4[%c0_60, %c0_61, %c0_62, %c0_63], %100 {strides = array<i32>} : memref<1x6x8x16xf32, #tpu.memory_space<vmem>>, vector<1x6x8x16xf32>,
    } else {
    }
    %c0 = arith.constant 0 : index
    %c0_1 = arith.constant 0 : index
    %c0_2 = arith.constant 0 : index
    %c0_3 = arith.constant 0 : index
    %3 = vector.load %arg2[%c0, %c0_1, %c0_2, %c0_3] : memref<1x2x16x16xf32, #tpu.memory_space<vmem>>, vector<1x2x16x16xf32>
    %4 = vector.shape_cast %3 : vector<1x2x16x16xf32> to vector<2x16x16xf32>
    %c0_4 = arith.constant 0 : index
    %c0_5 = arith.constant 0 : index
    %c0_6 = arith.constant 0 : index
    %5 = vector.load %arg3[%c0_4, %c0_5, %c0_6] : memref<1x16x16xi32, #tpu.memory_space<vmem>>, vector<1x16x16xi32>
    %6 = vector.shape_cast %5 : vector<1x16x16xi32> to vector<16x16xi32>
    %7 = vector.extract_strided_slice %4 {offsets = [0, 0, 0], sizes = [1, 16, 16], strides = [1, 1, 1]} : vector<2x16x16xf32> to vector<1x16x16xf32>
    %8 = vector.shape_cast %7 : vector<1x16x16xf32> to vector<16x16xf32>
    %9 = vector.extract_strided_slice %4 {offsets = [1, 0, 0], sizes = [1, 16, 16], strides = [1, 1, 1]} : vector<2x16x16xf32> to vector<1x16x16xf32>
    %10 = vector.shape_cast %9 : vector<1x16x16xf32> to vector<16x16xf32>
    %c1_i32 = arith.constant 1 : i32
    %11 = vector.broadcast %c1_i32 : i32 to vector<16x16xi32>
    %12 = arith.cmpi eq, %6, %11 : vector<16x16xi32>
    %13 = arith.subf %8, %10 : vector<16x16xf32>
    %14 = arith.subf %10, %8 : vector<16x16xf32>
    %15 = arith.select %12, %13, %14 : vector<16x16xi1>, vector<16x16xf32>
    %cst = arith.constant 0.000000e+00 : f32
    %16 = vector.broadcast %cst : f32 to vector<16x16xf32>
    %17 = arith.maximumf %15, %16 : vector<16x16xf32>
    %18 = math.absf %15 : vector<16x16xf32>
    %cst_7 = arith.constant 0.000000e+00 : f32
    %19 = vector.broadcast %cst_7 : f32 to vector<16x16xf32>
    %20 = arith.subf %19, %18 : vector<16x16xf32>
    %21 = math.exp %20 : vector<16x16xf32>
    %cst_8 = arith.constant 1.000000e+00 : f32
    %22 = vector.broadcast %cst_8 : f32 to vector<16x16xf32>
    %23 = arith.addf %22, %21 : vector<16x16xf32>
    %24 = math.log %23 : vector<16x16xf32>
    %25 = arith.addf %17, %24 : vector<16x16xf32>
    %26 = arith.cmpf ogt, %10, %8 : vector<16x16xf32>
    %27 = arith.xori %26, %12 : vector<16x16xi1>
    %c0_i32_9 = arith.constant 0 : i32
    %28 = vector.broadcast %c0_i32_9 : i32 to vector<16x16xi32>
    %29 = arith.cmpi eq, %6, %28 : vector<16x16xi32>
    %c0_10 = arith.constant 0 : index
    %c0_11 = arith.constant 0 : index
    %c0_12 = arith.constant 0 : index
    %c0_13 = arith.constant 0 : index
    %30 = vector.load %arg4[%c0_10, %c0_11, %c0_12, %c0_13] : memref<1x6x8x16xf32, #tpu.memory_space<vmem>>, vector<1x1x8x16xf32>
    %31 = vector.shape_cast %30 : vector<1x1x8x16xf32> to vector<8x16xf32>
    %32 = arith.extui %29 : vector<16x16xi1> to vector<16x16xi32>
    %33 = arith.sitofp %32 : vector<16x16xi32> to vector<16x16xf32>
    %34 = vector.extract_strided_slice %33 {offsets = [0, 0], sizes = [8, 16], strides = [1, 1]} : vector<16x16xf32> to vector<8x16xf32>
    %35 = vector.extract_strided_slice %33 {offsets = [8, 0], sizes = [8, 16], strides = [1, 1]} : vector<16x16xf32> to vector<8x16xf32>
    %36 = arith.addf %34, %35 : vector<8x16xf32>
    %37 = arith.addf %31, %36 : vector<8x16xf32>
    %c0_14 = arith.constant 0 : index
    %c0_15 = arith.constant 0 : index
    %c0_16 = arith.constant 0 : index
    %c0_17 = arith.constant 0 : index
    %38 = vector.load %arg4[%c0_14, %c0_15, %c0_16, %c0_17] : memref<1x6x8x16xf32, #tpu.memory_space<vmem>>, vector<1x1x8x16xf32>
    %39 = vector.shape_cast %38 : vector<1x1x8x16xf32> to vector<8x16xf32>
    %40 = vector.shape_cast %37 : vector<8x16xf32> to vector<1x1x8x16xf32>
    tpu.vector_store %arg4[%c0_14, %c0_15, %c0_16, %c0_17], %40 {strides = array<i32>} : memref<1x6x8x16xf32, #tpu.memory_space<vmem>>, vector<1x1x8x16xf32>,
    %c0_18 = arith.constant 0 : index
    %c2 = arith.constant 2 : index
    %c0_19 = arith.constant 0 : index
    %c0_20 = arith.constant 0 : index
    %41 = vector.load %arg4[%c0_18, %c2, %c0_19, %c0_20] : memref<1x6x8x16xf32, #tpu.memory_space<vmem>>, vector<1x1x8x16xf32>
    %42 = vector.shape_cast %41 : vector<1x1x8x16xf32> to vector<8x16xf32>
    %43 = arith.andi %29, %27 : vector<16x16xi1>
    %cst_21 = arith.constant 1.000000e+00 : f32
    %cst_22 = arith.constant 0.000000e+00 : f32
    %44 = vector.broadcast %cst_21 : f32 to vector<16x16xf32>
    %45 = vector.broadcast %cst_22 : f32 to vector<16x16xf32>
    %46 = arith.select %43, %44, %45 : vector<16x16xi1>, vector<16x16xf32>
    %47 = vector.extract_strided_slice %46 {offsets = [0, 0], sizes = [8, 16], strides = [1, 1]} : vector<16x16xf32> to vector<8x16xf32>
    %48 = vector.extract_strided_slice %46 {offsets = [8, 0], sizes = [8, 16], strides = [1, 1]} : vector<16x16xf32> to vector<8x16xf32>
    %49 = arith.addf %47, %48 : vector<8x16xf32>
    %50 = arith.addf %42, %49 : vector<8x16xf32>
    %c0_23 = arith.constant 0 : index
    %c2_24 = arith.constant 2 : index
    %c0_25 = arith.constant 0 : index
    %c0_26 = arith.constant 0 : index
    %51 = vector.load %arg4[%c0_23, %c2_24, %c0_25, %c0_26] : memref<1x6x8x16xf32, #tpu.memory_space<vmem>>, vector<1x1x8x16xf32>
    %52 = vector.shape_cast %51 : vector<1x1x8x16xf32> to vector<8x16xf32>
    %53 = vector.shape_cast %50 : vector<8x16xf32> to vector<1x1x8x16xf32>
    tpu.vector_store %arg4[%c0_23, %c2_24, %c0_25, %c0_26], %53 {strides = array<i32>} : memref<1x6x8x16xf32, #tpu.memory_space<vmem>>, vector<1x1x8x16xf32>,
    %c0_27 = arith.constant 0 : index
    %c4 = arith.constant 4 : index
    %c0_28 = arith.constant 0 : index
    %c0_29 = arith.constant 0 : index
    %54 = vector.load %arg4[%c0_27, %c4, %c0_28, %c0_29] : memref<1x6x8x16xf32, #tpu.memory_space<vmem>>, vector<1x1x8x16xf32>
    %55 = vector.shape_cast %54 : vector<1x1x8x16xf32> to vector<8x16xf32>
    %cst_30 = arith.constant 0.000000e+00 : f32
    %56 = vector.broadcast %cst_30 : f32 to vector<16x16xf32>
    %57 = arith.select %29, %25, %56 : vector<16x16xi1>, vector<16x16xf32>
    %58 = vector.extract_strided_slice %57 {offsets = [0, 0], sizes = [8, 16], strides = [1, 1]} : vector<16x16xf32> to vector<8x16xf32>
    %59 = vector.extract_strided_slice %57 {offsets = [8, 0], sizes = [8, 16], strides = [1, 1]} : vector<16x16xf32> to vector<8x16xf32>
    %60 = arith.addf %58, %59 : vector<8x16xf32>
    %61 = arith.addf %55, %60 : vector<8x16xf32>
    %c0_31 = arith.constant 0 : index
    %c4_32 = arith.constant 4 : index
    %c0_33 = arith.constant 0 : index
    %c0_34 = arith.constant 0 : index
    %62 = vector.load %arg4[%c0_31, %c4_32, %c0_33, %c0_34] : memref<1x6x8x16xf32, #tpu.memory_space<vmem>>, vector<1x1x8x16xf32>
    %63 = vector.shape_cast %62 : vector<1x1x8x16xf32> to vector<8x16xf32>
    %64 = vector.shape_cast %61 : vector<8x16xf32> to vector<1x1x8x16xf32>
    tpu.vector_store %arg4[%c0_31, %c4_32, %c0_33, %c0_34], %64 {strides = array<i32>} : memref<1x6x8x16xf32, #tpu.memory_space<vmem>>, vector<1x1x8x16xf32>,
    %c0_35 = arith.constant 0 : index
    %c1 = arith.constant 1 : index
    %c0_36 = arith.constant 0 : index
    %c0_37 = arith.constant 0 : index
    %65 = vector.load %arg4[%c0_35, %c1, %c0_36, %c0_37] : memref<1x6x8x16xf32, #tpu.memory_space<vmem>>, vector<1x1x8x16xf32>
    %66 = vector.shape_cast %65 : vector<1x1x8x16xf32> to vector<8x16xf32>
    %67 = arith.extui %12 : vector<16x16xi1> to vector<16x16xi32>
    %68 = arith.sitofp %67 : vector<16x16xi32> to vector<16x16xf32>
    %69 = vector.extract_strided_slice %68 {offsets = [0, 0], sizes = [8, 16], strides = [1, 1]} : vector<16x16xf32> to vector<8x16xf32>
    %70 = vector.extract_strided_slice %68 {offsets = [8, 0], sizes = [8, 16], strides = [1, 1]} : vector<16x16xf32> to vector<8x16xf32>
    %71 = arith.addf %69, %70 : vector<8x16xf32>
    %72 = arith.addf %66, %71 : vector<8x16xf32>
    %c0_38 = arith.constant 0 : index
    %c1_39 = arith.constant 1 : index
    %c0_40 = arith.constant 0 : index
    %c0_41 = arith.constant 0 : index
    %73 = vector.load %arg4[%c0_38, %c1_39, %c0_40, %c0_41] : memref<1x6x8x16xf32, #tpu.memory_space<vmem>>, vector<1x1x8x16xf32>
    %74 = vector.shape_cast %73 : vector<1x1x8x16xf32> to vector<8x16xf32>
    %75 = vector.shape_cast %72 : vector<8x16xf32> to vector<1x1x8x16xf32>
    tpu.vector_store %arg4[%c0_38, %c1_39, %c0_40, %c0_41], %75 {strides = array<i32>} : memref<1x6x8x16xf32, #tpu.memory_space<vmem>>, vector<1x1x8x16xf32>,
    %c0_42 = arith.constant 0 : index
    %c3 = arith.constant 3 : index
    %c0_43 = arith.constant 0 : index
    %c0_44 = arith.constant 0 : index
    %76 = vector.load %arg4[%c0_42, %c3, %c0_43, %c0_44] : memref<1x6x8x16xf32, #tpu.memory_space<vmem>>, vector<1x1x8x16xf32>
    %77 = vector.shape_cast %76 : vector<1x1x8x16xf32> to vector<8x16xf32>
    %78 = arith.andi %12, %27 : vector<16x16xi1>
    %cst_45 = arith.constant 1.000000e+00 : f32
    %cst_46 = arith.constant 0.000000e+00 : f32
    %79 = vector.broadcast %cst_45 : f32 to vector<16x16xf32>
    %80 = vector.broadcast %cst_46 : f32 to vector<16x16xf32>
    %81 = arith.select %78, %79, %80 : vector<16x16xi1>, vector<16x16xf32>
    %82 = vector.extract_strided_slice %81 {offsets = [0, 0], sizes = [8, 16], strides = [1, 1]} : vector<16x16xf32> to vector<8x16xf32>
    %83 = vector.extract_strided_slice %81 {offsets = [8, 0], sizes = [8, 16], strides = [1, 1]} : vector<16x16xf32> to vector<8x16xf32>
    %84 = arith.addf %82, %83 : vector<8x16xf32>
    %85 = arith.addf %77, %84 : vector<8x16xf32>
    %c0_47 = arith.constant 0 : index
    %c3_48 = arith.constant 3 : index
    %c0_49 = arith.constant 0 : index
    %c0_50 = arith.constant 0 : index
    %86 = vector.load %arg4[%c0_47, %c3_48, %c0_49, %c0_50] : memref<1x6x8x16xf32, #tpu.memory_space<vmem>>, vector<1x1x8x16xf32>
    %87 = vector.shape_cast %86 : vector<1x1x8x16xf32> to vector<8x16xf32>
    %88 = vector.shape_cast %85 : vector<8x16xf32> to vector<1x1x8x16xf32>
    tpu.vector_store %arg4[%c0_47, %c3_48, %c0_49, %c0_50], %88 {strides = array<i32>} : memref<1x6x8x16xf32, #tpu.memory_space<vmem>>, vector<1x1x8x16xf32>,
    %c0_51 = arith.constant 0 : index
    %c5 = arith.constant 5 : index
    %c0_52 = arith.constant 0 : index
    %c0_53 = arith.constant 0 : index
    %89 = vector.load %arg4[%c0_51, %c5, %c0_52, %c0_53] : memref<1x6x8x16xf32, #tpu.memory_space<vmem>>, vector<1x1x8x16xf32>
    %90 = vector.shape_cast %89 : vector<1x1x8x16xf32> to vector<8x16xf32>
    %cst_54 = arith.constant 0.000000e+00 : f32
    %91 = vector.broadcast %cst_54 : f32 to vector<16x16xf32>
    %92 = arith.select %12, %25, %91 : vector<16x16xi1>, vector<16x16xf32>
    %93 = vector.extract_strided_slice %92 {offsets = [0, 0], sizes = [8, 16], strides = [1, 1]} : vector<16x16xf32> to vector<8x16xf32>
    %94 = vector.extract_strided_slice %92 {offsets = [8, 0], sizes = [8, 16], strides = [1, 1]} : vector<16x16xf32> to vector<8x16xf32>
    %95 = arith.addf %93, %94 : vector<8x16xf32>
    %96 = arith.addf %90, %95 : vector<8x16xf32>
    %c0_55 = arith.constant 0 : index
    %c5_56 = arith.constant 5 : index
    %c0_57 = arith.constant 0 : index
    %c0_58 = arith.constant 0 : index
    %97 = vector.load %arg4[%c0_55, %c5_56, %c0_57, %c0_58] : memref<1x6x8x16xf32, #tpu.memory_space<vmem>>, vector<1x1x8x16xf32>
    %98 = vector.shape_cast %97 : vector<1x1x8x16xf32> to vector<8x16xf32>
    %99 = vector.shape_cast %96 : vector<8x16xf32> to vector<1x1x8x16xf32>
    tpu.vector_store %arg4[%c0_55, %c5_56, %c0_57, %c0_58], %99 {strides = array<i32>} : memref<1x6x8x16xf32, #tpu.memory_space<vmem>>, vector<1x1x8x16xf32>,
    return
  }
  func.func @transform_0(%arg0: i32, %arg1: i32) -> (i32, i32, i32, i32) {
    %c0_i32 = arith.constant 0 : i32
    %c0_i32_0 = arith.constant 0 : i32
    %c0_i32_1 = arith.constant 0 : i32
    return %arg0, %c0_i32, %arg1, %c0_i32_0 : i32, i32, i32, i32
  }
  func.func @transform_1(%arg0: i32, %arg1: i32) -> (i32, i32, i32) {
    %c0_i32 = arith.constant 0 : i32
    %c0_i32_0 = arith.constant 0 : i32
    return %arg0, %arg1, %c0_i32 : i32, i32, i32
  }
  func.func @transform_2(%arg0: i32, %arg1: i32) -> (i32, i32, i32, i32) {
    %c0_i32 = arith.constant 0 : i32
    %c0_i32_0 = arith.constant 0 : i32
    %c0_i32_1 = arith.constant 0 : i32
    %c0_i32_2 = arith.constant 0 : i32
    return %arg0, %c0_i32, %c0_i32_0, %c0_i32_1 : i32, i32, i32, i32
  }
}

</mosaic_0001>

<bundles_post_ra>
// kernel: recall_cross_entropy.1
= control target key start
LH: loop header
LB: loop body
LE: loop exit
PB: predicated region body
PF: predicated region fallthrough
CT: control target
= control target key end

     0   :  { %7 = vsyncpa [#allocation3], 0  ;;  %s889_s0 = inlined_call_operand.hbm [shape: f32[2,2,16,16], index: 0, kind: input, shape index: {}]   ;;  %s890_s1 = inlined_call_operand.hbm [shape: s32[2,16,16], index: 1, kind: input, shape index: {}]   ;;  %s891_s2 = inlined_call_operand.vmem [shape: f32[2,6,8,16], index: 2, kind: output, shape index: {}]  }
   0x1   :  { %9 = vsyncpa [#allocation3 + $0x1], 0 }
   0x2   :  { %10 = vsyncpa [#allocation5], 0 }
   0x3   :  { %12 = vsyncpa [#allocation5 + $0x1], 0  ;;  %s665_s9 = smov 0   ;;  %s667_s10 = smov 0  }
   0x4   :  { %s669_s11 = smov 0   ;;  %s671_s12 = smov 0  }
   0x5   :  { %s673_s13 = smov 0   ;;  %s675_s14 = smov 0  }
   0x6 LB: > { %s429_s15 = sadd.s32 4294967295, %s643_s14   ;;  %s30_s16 = sadd.s32 1, %s639_s13  ;;  %s643_s14 = sphi %s675_s14, %s18_s14   ;;  %s639_s13 = sphi %s673_s13, %s904_s13   ;;  %s635_s12 = sphi %s671_s12, %s903_s12   ;;  %s631_s11 = sphi %s669_s11, %s902_s11   ;;  %s627_s10 = sphi %s667_s10, %s901_s10   ;;  %s623_s9 = sphi %s665_s9, %s900_s9  }
   0x7   : > { %p32_p0 = scmp.ge.s32.totalorder %s30_s16, 2  ;;  %s39_s17 = sadd.s32 1, %s631_s11 }
   0x8   : > { %p46_p1 = scmp.ne.s32.totalorder %s631_s11, %s627_s10  ;;  %p47_p2 = scmp.eq.s32.totalorder %s643_s14, 0 }
   0x9   : > { %s906_s16 = smov (%p32_p0, %s30_s16), 0  ;;  %p52_p4 = scmp.ne.s32.totalorder %s627_s10, %s623_s9 }
   0xa   : > { %p701_p3 = por %p47_p2, %p46_p1  ;;  %s34_s19 = ssub.s32 %s639_s13, %s906_s16 }
   0xb   : > { %p53_p5 = scmp.eq.s32.totalorder %s429_s15, 0  ;;  %p37_p6 = scmp.eq.s32.totalorder %s34_s19, 0 }
   0xc   : > { %p473_p8 = scmp.lt.s32.totalorder %s643_s14, 2  ;;  %s717_s22 = sand.u32 1, %s631_s11  }
   0xd   : > { %p708_p7 = por %p53_p5, %p52_p4  ;;  %s459_s23 = sshll.u32 %s639_s13, 9 }
   0xe   : > { %s714_s21 = scalar_select %p37_p6, %s631_s11, %s39_s17  }
   0xf   : > { %s433_s24 = sshll.u32 %s717_s22, 5  ;;  %s142_s27 = scalar_lea.hbm %s889_s0, %s459_s23 }
  0x10   : > { %s134_s28 = scalar_lea.vmem [#allocation2], %s433_s24  ;;  %p726_p9 = pnand %p473_p8, %p701_p3 }
  0x11   : > { %s143_s29 = sshll.u32 %s134_s28, 4  ;;  %s131_s3 = scalar_lea.sflag [#allocation3], %s717_s22  ;;  %s144_s29 = int_to_ptr.vmem [resolvable:$true] %s143_s29 }
  0x12   : > { %p535_p10 = pneg %p726_p9  ;;  %s546_s4 = scalar_lea.vmem %s144_s29, 512 }
  0x13   : > { %p547_p11 = scmp.ne.s32.totalorder %s144_s29, %s546_s4  ;;  %s645_s5 = smov [#allocation2]  }
  0x14   : > { %s551_s6 = sshll.u32 %s645_s5, 4  ;;  %s552_s6 = int_to_ptr.vmem [resolvable:$false] %s551_s6 }
  0x15   : > { %p549_p12 = pnand %p547_p11, %p535_p10  ;;  %s553_s7 = scalar_lea.vmem %s552_s6, 1024 }
  0x16   : > { %p554_p0 = scmp.lt.s32.totalorder %s144_s29, %s552_s6  ;;  %p555_p1 = scmp.lt.s32.totalorder %s553_s7, %s546_s4 }
  0x17   : > { %p550_p13 = pneg %p549_p12 }
  0x18   : > { %p556_p2 = por %p555_p1, %p554_p0 }
  0x1a   : > { %p557_p3 = pnand %p556_p2, %p550_p13 }
  0x1c   : > { %560 = shalt.err (!%p557_p3)
}
  0x1d   : > { %s646_s8 = smov 128   ;;  %s647_s9 = smov 8  }
  0x1e   : > { %469 = dma.hbm_to_vmem [thread:$0]  (!%p726_p9), %s142_s27, 512, %s144_s29, %s131_s3, %s646_s8, %s646_s8, %s647_s9  }
  0x1f   : > { %p439_p4 = scmp.ge.s32.totalorder %s643_s14, 1  ;;  %p174_p5 = scmp.lt.s32.totalorder %s643_s14, 3 }
  0x20   : > { %s436_s15 = sshll.u32 %s717_s22, 4  ;;  %s460_s18 = sshll.u32 %s639_s13, 8 }
  0x21   : > { %p744_p6 = pnand %p439_p4, %p174_p5  ;;  %s157_s19 = scalar_lea.vmem [#allocation4], %s436_s15 }
  0x22   : > { %s166_s23 = sshll.u32 %s157_s19, 4  ;;  %s165_s26 = scalar_lea.hbm %s890_s1, %s460_s18  ;;  %s167_s23 = int_to_ptr.vmem [resolvable:$true] %s166_s23 }
  0x23   : > { %s154_s28 = scalar_lea.sflag [#allocation5], %s717_s22  ;;  %s574_s4 = scalar_lea.vmem %s167_s23, 256 }
  0x24   : > { %p575_p8 = scmp.ne.s32.totalorder %s167_s23, %s574_s4  ;;  %s648_s27 = smov [#allocation4]  }
  0x25   : > { %s579_s29 = sshll.u32 %s648_s27, 4  ;;  %s580_s29 = int_to_ptr.vmem [resolvable:$false] %s579_s29 }
  0x26   : > { %p577_p11 = pnand %p575_p8, %p535_p10  ;;  %s581_s3 = scalar_lea.vmem %s580_s29, 512 }
  0x27   : > { %p582_p13 = scmp.lt.s32.totalorder %s167_s23, %s580_s29  ;;  %p583_p0 = scmp.lt.s32.totalorder %s581_s3, %s574_s4 }
  0x28   : > { %p578_p12 = pneg %p577_p11 }
  0x29   : > { %p584_p1 = por %p583_p0, %p582_p13 }
  0x2b   : > { %p585_p2 = pnand %p584_p1, %p578_p12 }
  0x2d   : > { %588 = shalt.err (!%p585_p2)
}
  0x2e   : > { %472 = dma.hbm_to_vmem [thread:$0]  (!%p726_p9), %s165_s26, 256, %s167_s23, %s154_s28, %s646_s8, %s646_s8, %s647_s9  }
  0x2f   : > { %178 = sbr.rel (%p744_p6) target bundleno = 109 (0x6d), region = 28  ;;  %s180_s22 = sand.u32 (!%p744_p6), 1, %s627_s10  }
  0x30   : > { %s440_s5 = sshll.u32 (!%p744_p6), %s180_s22, 5  ;;  %s181_s6 = scalar_lea.sflag (!%p744_p6), [#allocation3], %s180_s22 }
  0x31   : > { %s764_s7 = scalar_lea.vmem (!%p744_p6), [#allocation2], %s440_s5 }
  0x34   : > { %614 = dma.done.wait (%p708_p7), %s181_s6, 512  }
  0x35   : > { %616 = vsyncadd (%p708_p7), %s181_s6, 4294966784  ;;  %s441_s30 = sshll.u32 %s180_s22, 4  ;;  %s190_s15 = scalar_lea.sflag [#allocation5], %s180_s22 }
  0x36   : > { %s193_s18 = scalar_lea.vmem [#allocation4], %s441_s30 }
  0x37   : > { %618 = dma.done.wait (%p708_p7), %s190_s15, 256  }
  0x38   : > { %620 = vsyncadd (%p708_p7), %s190_s15, 4294967040  ;;  %p221_p9 = scmp.lt.s32.totalorder %s635_s12, 1  ;;  %vm230_vm0 = vcmask 130048   ;;  %v649_v0 = vmov 0.0   ;;  %v793_v1 = vld [vmem:[%s193_s18] sm:$0xff]  ;;  %v795_v2 = vld [vmem:[%s193_s18 + $0x8] sm:$0xff] }
  0x39   : > { %v237_v3 = vld [vmem:[%s764_s7] sm:$0xff]  ;;  %vm243_vm1 = vcmp.eq.s32.totalorder %v793_v1, 1  ;;  %vm244_vm2 = vcmp.eq.s32.totalorder %v795_v2, 1  ;;  %vm273_vm3 = vcmp.eq.s32.totalorder %v793_v1, 0  ;;  %vm274_vm4 = vcmp.eq.s32.totalorder %v795_v2, 0  ;;  %v238_v4 = vld [vmem:[%s764_s7 + $0x8] sm:$0xff] }
  0x3a   : > { %s908_s12 = smov (!%p221_p9, %s635_s12), 1  ;;  %v239_v5 = vld [vmem:[%s764_s7 + $0x10] sm:$0xff]  ;;  %v443_v6 = vsel %vm273_vm3, 1.0, %v649_v0  ;;  %v444_v7 = vsel %vm274_vm4, 1.0, %v649_v0  ;;  %v240_v8 = vld [vmem:[%s764_s7 + $0x18] sm:$0xff]  ;;  %v450_v16 = vsel %vm243_vm1, 1.0, %v649_v0 }
  0x3b   : > { %s461_s8 = smul.u32 48, %s908_s12  ;;  %v245_v9 = vsub.f32 %v237_v3, %v239_v5  ;;  %v247_v10 = vsub.f32 %v239_v5, %v237_v3  ;;  %v280_v11 = vadd.f32 %v444_v7, %v443_v6  ;;  %v246_v12 = vsub.f32 %v238_v4, %v240_v8 }
  0x3c   : > { %v248_v13 = vsub.f32 %v240_v8, %v238_v4  ;;  %vm269_vm5 = vcmp.gt.f32.partialorder %v239_v5, %v237_v3  ;;  %vm270_vm6 = vcmp.gt.f32.partialorder %v240_v8, %v238_v4  ;;  %v451_v17 = vsel %vm244_vm2, 1.0, %v649_v0 }
  0x3d   : > { %s779_s19 = scalar_lea.vmem %s891_s2, %s461_s8  ;;  %vm811_vm7 = vmxor %vm269_vm5, %vm243_vm1  ;;  %v249_v15 = vsel %vm243_vm1, %v245_v9, %v247_v10  ;;  %v306_v21 = vadd.f32 %v451_v17, %v450_v16 }
  0x3e   : > { %231 = vst.msk [vmem:[%s779_s19] sm:$0xff] %vm230_vm0, %v649_v0  ;;  %232 = vst.msk [vmem:[%s779_s19 + $0x8] sm:$0xff] %vm230_vm0, %v649_v0  ;;  %v250_v19 = vsel %vm244_vm2, %v246_v12, %v248_v13  ;;  %v253_v20 = vand.u32 2147483647, %v249_v15  ;;  %v251_v45 = vmax.f32 %v249_v15, 0.0 }
  0x3f   : > { %233 = vst.msk [vmem:[%s779_s19 + $0x10] sm:$0xff] %vm230_vm0, %v649_v0  ;;  %234 = vst.msk [vmem:[%s779_s19 + $0x18] sm:$0xff] %vm230_vm0, %v649_v0  ;;  %v254_v22 = vand.u32 2147483647, %v250_v19  ;;  %v252_v47 = vmax.f32 %v250_v19, 0.0 }
  0x40   : > { %235 = vst.msk [vmem:[%s779_s19 + $0x20] sm:$0xff] %vm230_vm0, %v649_v0  ;;  %236 = vst.msk [vmem:[%s779_s19 + $0x28] sm:$0xff] %vm230_vm0, %v649_v0  ;;  %v255_v25 = vsub.f32 0.0, %v253_v20 }
  0x41   : > { %vm823_vm8 = vmxor %vm270_vm6, %vm244_vm2  ;;  %v256_v29 = vsub.f32 0.0, %v254_v22 }
  0x42   : > { %vm286_vm9 = vmand %vm273_vm3, %vm811_vm7  ;;  %v257_v32 = vmul.f32 1.442695, %v255_v25 }
  0x43   : > { %vm287_vm10 = vmand %vm274_vm4, %vm823_vm8  ;;  %v288_v24 = vsel %vm286_vm9, 1.0, %v649_v0  ;;  %v259_v34 = vmul.f32 1.442695, %v256_v29 }
  0x44   : > { %v289_v28 = vsel %vm287_vm10, 1.0, %v649_v0  ;;  %vm311_vm11 = vmand %vm243_vm1, %vm811_vm7  ;;  %525 = vpow2.f32 %v257_v32 }
  0x45   : > { %v275_v23 = vld [vmem:[%s779_s19] sm:$0xff]  ;;  %v449_v30 = vld [vmem:[%s779_s19 + $0x8] sm:$0xff]  ;;  %v290_v31 = vadd.f32 %v289_v28, %v288_v24  ;;  %vm312_vm12 = vmand %vm244_vm2, %vm823_vm8  ;;  %v313_v35 = vsel %vm311_vm11, 1.0, %v649_v0  ;;  %527 = vpow2.f32 %v259_v34 }
  0x46   : > { %v281_v26 = vadd.f32 %v280_v11, %v275_v23  ;;  %v445_v27 = vld [vmem:[%s779_s19 + $0x10] sm:$0xff]  ;;  %v307_v33 = vadd.f32 %v449_v30, %v306_v21  ;;  %v453_v37 = vld [vmem:[%s779_s19 + $0x18] sm:$0xff]  ;;  %v314_v38 = vsel %vm312_vm12, 1.0, %v649_v0 }
  0x47   : > { %v291_v36 = vadd.f32 %v445_v27, %v290_v31  ;;  %v315_v39 = vadd.f32 %v314_v38, %v313_v35  ;;  %v447_v55 = vld [vmem:[%s779_s19 + $0x20] sm:$0xff]  ;;  %v455_v57 = vld [vmem:[%s779_s19 + $0x28] sm:$0xff] }
  0x48   : > { %283 = vst.msk [vmem:[%s779_s19] sm:$0xff] %vm230_vm0, %v281_v26  ;;  %452 = vst.msk [vmem:[%s779_s19 + $0x8] sm:$0xff] %vm230_vm0, %v307_v33 }
  0x49   : > { %446 = vst.msk [vmem:[%s779_s19 + $0x10] sm:$0xff] %vm230_vm0, %v291_v36  ;;  %v316_v40 = vadd.f32 %v453_v37, %v315_v39 }
  0x4b   : > { %454 = vst.msk [vmem:[%s779_s19 + $0x18] sm:$0xff] %vm230_vm0, %v316_v40 }
  0x51   : > { %v526_v41 = vpop.eup %525 }
  0x52   : > { %v528_v42 = vpop.eup %527  ;;  %v261_v43 = vadd.f32 1.0, %v526_v41 }
  0x53   : > { %v262_v44 = vadd.f32 1.0, %v528_v42 }
  0x54   : > { %529 = vlog2.f32 %v261_v43 }
  0x55   : > { %531 = vlog2.f32 %v262_v44 }
  0x61   : > { %v530_v46 = vpop.eup %529 }
  0x62   : > { %v532_v48 = vpop.eup %531  ;;  %v264_v49 = vmul.f32 0.6931472, %v530_v46 }
  0x63   : > { %v266_v50 = vmul.f32 0.6931472, %v532_v48 }
  0x64   : > { %v267_v51 = vadd.f32 %v264_v49, %v251_v45 }
  0x65   : > { %v268_v52 = vadd.f32 %v266_v50, %v252_v47 }
  0x66   : > { %v295_v53 = vsel %vm273_vm3, %v267_v51, 0.0  ;;  %v320_v54 = vsel %vm243_vm1, %v267_v51, 0.0 }
  0x67   : > { %v296_v56 = vsel %vm274_vm4, %v268_v52, 0.0  ;;  %v321_v58 = vsel %vm244_vm2, %v268_v52, 0.0 }
  0x68   : > { %v297_v59 = vadd.f32 %v296_v56, %v295_v53  ;;  %v322_v60 = vadd.f32 %v321_v58, %v320_v54 }
  0x6a   : > { %v298_v61 = vadd.f32 %v447_v55, %v297_v59  ;;  %v323_v62 = vadd.f32 %v455_v57, %v322_v60 }
  0x6c   : > { %448 = vst.msk [vmem:[%s779_s19 + $0x20] sm:$0xff] %vm230_vm0, %v298_v61  ;;  %456 = vst.msk [vmem:[%s779_s19 + $0x28] sm:$0xff] %vm230_vm0, %v323_v62 }
  0x6d PF: > { %s18_s14 = sadd.s32 1, %s643_s14   ;;  %s900_s9 = smov %s627_s10 }
  0x6e   : > { %p15_p7 = scmp.ge.s32.totalorder %s18_s14, 4   ;;  %s901_s10 = smov %s631_s11 }
  0x6f   : > { %s902_s11 = smov %s714_s21  ;;  %s903_s12 = smov %s639_s13 }
  0x70   : > { %s904_s13 = smov %s906_s16  ;;  %17 = sbr.rel (!%p15_p7) target bundleno = 6 (0x6), region = 90 }
  0x75   :  { %346 = vsyncpa [#allocation3], 1 }
  0x76   :  { %348 = vsyncpa [#allocation3 + $0x1], 1 }
  0x77   :  { %349 = vsyncpa [#allocation5], 1 }
  0x78   :  { %351 = vsyncpa [#allocation5 + $0x1], 1 }

</bundles_post_ra>
